<compile_context>
chip_gen: v7x
topology: tpu7x:2x2x1
jax: 0.10.0
libtpu: 0.0.40
codegen_flags: <defaults>
</compile_context>

<pallas_src>
import math
from functools import lru_cache, partial

import numpy as np
import jax
import jax.numpy as jnp
from jax.experimental import pallas as pl
from jax.experimental.pallas import tpu as pltpu


_VMEM_LIMIT_BYTES = 48 * 1024 * 1024     # safe on v5e/v6e (128 MiB) and v7x (64 MiB) VMEM
_VMEM_BLOCK_BUDGET = 24 * 1024 * 1024    # soft cap for the per-step working set


def _nearest_indices(in_dim: int, out_dim: int) -> np.ndarray:
    # Matches torch: floor(arange(out, float32) * (in/out)), clamped to [0, in-1].
    src = np.floor(np.arange(out_dim, dtype=np.float32) * np.float32(in_dim / out_dim))
    return np.clip(src.astype(np.int64), 0, in_dim - 1)


@lru_cache(maxsize=64)
def _sel_w(w_in: int, w_out: int, dtype_name: str):
    """One-hot column-selection matrix (W_in, W_out): x @ sel_w gathers columns."""
    idx = _nearest_indices(w_in, w_out)
    m = np.zeros((w_in, w_out), dtype=np.float32)
    m[idx, np.arange(w_out)] = 1.0
    return jnp.asarray(m, dtype=dtype_name)


@lru_cache(maxsize=64)
def _sel_h(h_out: int, h_in: int, dtype_name: str):
    """One-hot row-selection matrix (H_out, H_in): sel_h @ x gathers rows."""
    idx = _nearest_indices(h_in, h_out)
    m = np.zeros((h_out, h_in), dtype=np.float32)
    m[np.arange(h_out), idx] = 1.0
    return jnp.asarray(m, dtype=dtype_name)


def _int_h_kernel(sel_w_ref, x_ref, o_ref, *, sf_h):
    # x_ref:     (c_blk*H_in, W_in)
    # sel_w_ref: (W_in, W_out)
    # o_ref:     (c_blk*H_in, sf_h*W_out) -- each input row's W-gathered result is
    #            repeated sf_h times along the lane dim; the wrapper's free reshape
    #            turns that into sf_h adjacent output rows (integer nearest upsample).
    t = jnp.dot(x_ref[...], sel_w_ref[...], preferred_element_type=jnp.float32)
    t = t.astype(o_ref.dtype)
    if sf_h == 1:
        o_ref[...] = t
    else:
        o_ref[...] = jnp.concatenate([t] * sf_h, axis=-1)


def _general_kernel(sel_h_ref, sel_w_ref, x_ref, o_ref, *, c_blk, h_in, h_out):
    # x_ref: (c_blk*H_in, W_in), sel_h: (H_out, H_in), sel_w: (W_in, W_out)
    # o_ref: (c_blk*H_out, W_out)
    xw = jnp.dot(x_ref[...], sel_w_ref[...], preferred_element_type=jnp.float32)
    sel_h = sel_h_ref[...]
    for c in range(c_blk):  # static unroll; c_blk is small
        o_ref[c * h_out:(c + 1) * h_out, :] = jnp.dot(
            sel_h, xw[c * h_in:(c + 1) * h_in, :],
            preferred_element_type=jnp.float32).astype(o_ref.dtype)


def _pick_c_blk(nc, h_in, w_in, w_out, rows_out, cols_out, itemsize):
    # c_blk*h_in and c_blk*rows_out must be multiples of 8 (sublane constraint),
    # unless the block covers the whole array (handled by the caller).
    unit = max(8 // math.gcd(h_in, 8), 8 // math.gcd(rows_out, 8))
    rup = lambda v, m: -(-v // m) * m
    c_blk = rup(8, unit)                         # target ~8 planes per grid step
    if nc >= 2 * unit:                           # keep >= 2 grid steps (v7x has 2 TCs)
        c_blk = min(c_blk, rup(-(-nc // 2), unit))
    c_blk = min(c_blk, rup(nc, unit))
    # per-step working set: double-buffered in/out blocks + f32 intermediate
    per_plane = 2 * (h_in * w_in + rows_out * cols_out) * itemsize + h_in * w_out * 4
    while c_blk > unit and c_blk * per_plane > _VMEM_BLOCK_BUDGET:
        c_blk -= unit
    return c_blk


def upsample_nd(x, *, scale_factor=None, size=None, mode="nearest", align_corners=None):
    """UpsampleNd.forward (nearest mode) for 2 spatial dims, NCHW layout."""
    if (size is None) == (scale_factor is None):
        raise ValueError("Exactly one of size or scale_factor must be specified")
    if mode != "nearest":
        # TODO(synk): bilinear/trilinear modes of nn.Upsample are not implemented here.
        raise NotImplementedError("only 'nearest' mode is implemented in the Pallas kernel")

    N, C = x.shape[0], x.shape[1]
    in_spatial = x.shape[2:]
    num_dims = len(in_spatial)
    if num_dims != 2:
        # TODO(synk): general n-D spatial gather; this kernel covers the 2D (NCHW) case.
        raise NotImplementedError("Pallas kernel implemented for 2 spatial dims (NCHW)")

    if size is not None:
        if not isinstance(size, (list, tuple)):
            size = tuple(size for _ in range(num_dims))
        target = tuple(int(s) for s in size)
    else:
        if not isinstance(scale_factor, (list, tuple)):
            scale_factor = tuple(scale_factor for _ in range(num_dims))
        target = tuple(int(s * sf) for s, sf in zip(in_spatial, scale_factor))

    H_in, W_in = (int(d) for d in in_spatial)
    H_out, W_out = target

    orig_dtype = x.dtype
    if not jnp.issubdtype(x.dtype, jnp.floating):
        # TODO(synk): integer inputs beyond f32's 24-bit mantissa lose exactness here.
        x = x.astype(jnp.float32)
    cdt = x.dtype
    itemsize = np.dtype(cdt).itemsize
    dtype_name = np.dtype(cdt).name

    # Integer H scale -> the row gather is pure replication (verified against the indices).
    h_idx = _nearest_indices(H_in, H_out)
    fast_h = (H_out % H_in == 0) and np.array_equal(
        h_idx, np.arange(H_out) // max(H_out // H_in, 1))

    NC = N * C
    rows_out = H_in if fast_h else H_out                       # output rows per plane in-kernel
    cols_out = (H_out // H_in) * W_out if fast_h else W_out    # output lane width in-kernel

    c_blk = _pick_c_blk(NC, H_in, W_in, W_out, rows_out, cols_out, itemsize)
    if c_blk >= NC:
        c_blk = NC             # whole-array block: exempt from the /8 sublane rule
        nc_pad = NC
    else:
        nc_pad = -(-NC // c_blk) * c_blk
    grid = nc_pad // c_blk

    x2d = x.reshape(NC * H_in, W_in)
    if nc_pad != NC:
        x2d = jnp.pad(x2d, ((0, (nc_pad - NC) * H_in), (0, 0)))

    # TODO(synk): for very large H_out/W_out the resident selection matrices should be
    # tiled via extra grid axes to stay within v7x's smaller VMEM.
    sel_w = _sel_w(W_in, W_out, dtype_name)
    compiler_params = pltpu.CompilerParams(
        dimension_semantics=("parallel",),
        vmem_limit_bytes=_VMEM_LIMIT_BYTES,
    )

    if fast_h:
        sf_h = H_out // H_in
        out2d = pl.pallas_call(
            partial(_int_h_kernel, sf_h=sf_h),
            out_shape=jax.ShapeDtypeStruct((nc_pad * H_in, sf_h * W_out), cdt),
            grid_spec=pltpu.PrefetchScalarGridSpec(
                num_scalar_prefetch=0,
                grid=(grid,),
                in_specs=[
                    pl.BlockSpec((W_in, W_out), lambda i: (0, 0)),
                    pl.BlockSpec((c_blk * H_in, W_in), lambda i: (i, 0)),
                ],
                out_specs=pl.BlockSpec((c_blk * H_in, sf_h * W_out), lambda i: (i, 0)),
            ),
            compiler_params=compiler_params,
        )(sel_w, x2d)
        out = out2d.reshape(nc_pad, H_in, sf_h, W_out)[:NC]
        out = out.reshape(N, C, H_out, W_out)
    else:
        sel_h = _sel_h(H_out, H_in, dtype_name)
        out2d = pl.pallas_call(
            partial(_general_kernel, c_blk=c_blk, h_in=H_in, h_out=H_out),
            out_shape=jax.ShapeDtypeStruct((nc_pad * H_out, W_out), cdt),
            grid_spec=pltpu.PrefetchScalarGridSpec(
                num_scalar_prefetch=0,
                grid=(grid,),
                in_specs=[
                    pl.BlockSpec((H_out, H_in), lambda i: (0, 0)),
                    pl.BlockSpec((W_in, W_out), lambda i: (0, 0)),
                    pl.BlockSpec((c_blk * H_in, W_in), lambda i: (i, 0)),
                ],
                out_specs=pl.BlockSpec((c_blk * H_out, W_out), lambda i: (i, 0)),
            ),
            compiler_params=compiler_params,
        )(sel_h, sel_w, x2d)
        out = out2d.reshape(nc_pad, H_out, W_out)[:NC]
        out = out.reshape(N, C, H_out, W_out)

    if out.dtype != orig_dtype:
        out = out.astype(orig_dtype)
    return out


if __name__ == "__main__":
    key = jax.random.PRNGKey(0)
    N, C, H, W = 2, 4, 16, 16
    x = jax.random.normal(key, (N, C, H, W), dtype=jnp.float32)

    # 1) Integer-scale fast path (lane-dense replication store), like
    #    UpsampleNd(num_dims=2, scale_factor=(2, 2), mode='nearest').
    out = upsample_nd(x, scale_factor=(2.0, 2.0), mode="nearest")
    out = jax.block_until_ready(out)
    h_idx = _nearest_indices(H, 2 * H)
    w_idx = _nearest_indices(W, 2 * W)
    ref = x[:, :, h_idx, :][:, :, :, w_idx]
    assert out.shape == (N, C, 2 * H, 2 * W)
    np.testing.assert_allclose(np.asarray(out), np.asarray(ref), rtol=0, atol=0)

    # 2) General (non-integer) path via explicit target size.
    out2 = upsample_nd(x, size=(24, 20), mode="nearest")
    out2 = jax.block_until_ready(out2)
    h_idx2 = _nearest_indices(H, 24)
    w_idx2 = _nearest_indices(W, 20)
    ref2 = x[:, :, h_idx2, :][:, :, :, w_idx2]
    assert out2.shape == (N, C, 24, 20)
    np.testing.assert_allclose(np.asarray(out2), np.asarray(ref2), rtol=0, atol=0)

    print("KERNEL_OK")
</pallas_src>

<mosaic_0001>
module attributes {stable_mosaic.version = 11 : i64} {
  func.func @_int_h_kernel(%arg0: i32, %arg1: memref<16x32xf32, #tpu.memory_space<vmem>>, %arg2: memref<64x16xf32, #tpu.memory_space<vmem>>, %arg3: memref<64x64xf32, #tpu.memory_space<vmem>>) attributes {dimension_semantics = [#tpu.dimension_semantics<parallel>], iteration_bounds = array<i64: 2>, scalar_prefetch = 0 : i64, scratch_operands = 0 : i64, tpu.core_type = #tpu.core_type<tc>, window_params = [{pipeline_mode = #tpu.pipeline_mode<synchronous>, transform_indices = @transform_0, window_bounds = array<i64: 16, 32>}, {transform_indices = @transform_1, window_bounds = array<i64: 64, 16>}, {transform_indices = @transform_2, window_bounds = array<i64: 64, 64>}]} {
    %c0 = arith.constant 0 : index
    %c0_0 = arith.constant 0 : index
    %0 = vector.load %arg2[%c0, %c0_0] : memref<64x16xf32, #tpu.memory_space<vmem>>, vector<64x16xf32>
    %c0_1 = arith.constant 0 : index
    %c0_2 = arith.constant 0 : index
    %1 = vector.load %arg1[%c0_1, %c0_2] : memref<16x32xf32, #tpu.memory_space<vmem>>, vector<16x32xf32>
    %cst = arith.constant dense<0.000000e+00> : vector<64x32xf32>
    %2 = tpu.matmul %0, %1, %cst {dimension_numbers = #tpu.dot_dimension_numbers<[1], [0], [0], [1], [0, 0, 1, 1], [], []>} : vector<64x16xf32>, vector<16x32xf32>, vector<64x32xf32> -> vector<64x32xf32>
    %3 = tpu.concatenate %2, %2 in 1 : vector<64x32xf32>, vector<64x32xf32> -> vector<64x64xf32>
    %c0_3 = arith.constant 0 : index
    %c0_4 = arith.constant 0 : index
    %4 = vector.load %arg3[%c0_3, %c0_4] : memref<64x64xf32, #tpu.memory_space<vmem>>, vector<64x64xf32>
    tpu.vector_store %arg3[%c0_3, %c0_4], %3 {strides = array<i32>} : memref<64x64xf32, #tpu.memory_space<vmem>>, vector<64x64xf32>,
    return
  }
  func.func @transform_0(%arg0: i32) -> (i32, i32) {
    %c0_i32 = arith.constant 0 : i32
    %c0_i32_0 = arith.constant 0 : i32
    %c0_i32_1 = arith.constant 0 : i32
    return %c0_i32, %c0_i32_0 : i32, i32
  }
  func.func @transform_1(%arg0: i32) -> (i32, i32) {
    %c0_i32 = arith.constant 0 : i32
    %c0_i32_0 = arith.constant 0 : i32
    return %arg0, %c0_i32 : i32, i32
  }
  func.func @transform_2(%arg0: i32) -> (i32, i32) {
    %c0_i32 = arith.constant 0 : i32
    %c0_i32_0 = arith.constant 0 : i32
    return %arg0, %c0_i32 : i32, i32
  }
}

</mosaic_0001>

<bundles_post_ra>
// kernel: tpu_custom_call.1
= control target key start
LH: loop header
LB: loop body
LE: loop exit
PB: predicated region body
PF: predicated region fallthrough
CT: control target
= control target key end

     0   :  { %s477_s9 = smov 0   ;;  %s531_s0 = inlined_call_operand.vmem [shape: f32[16,32], index: 0, kind: input, shape index: {}]   ;;  %s532_s1 = inlined_call_operand.vmem [shape: f32[128,16], index: 1, kind: input, shape index: {}]   ;;  %s533_s2 = inlined_call_operand.vmem [shape: f32[128,64], index: 2, kind: output, shape index: {}]  }
   0x1 LB: > { %s393_s10 = sadd.s32 4294967295, %s459_s9   ;;  %p397_p0 = scmp.ge.s32.totalorder %s459_s9, 1  ;;  %s459_s9 = sphi %s477_s9, %s12_s9  }
   0x2   : > { %p113_p1 = scmp.lt.s32.totalorder %s459_s9, 3 }
   0x4   : > { %p114_p2 = pnand %p397_p0, %p113_p1 }
   0x5   : > { %v155_v0 = vld [vmem:[%s531_s0] sm:$0xff] (!%p114_p2)  ;;  %v156_v1 = vld [vmem:[%s531_s0 + $0x8] sm:$0xff] (!%p114_p2)  ;;  %s398_s15 = sshll.u32 (!%p114_p2), %s393_s10, 3  ;;  %vm157_vm0 = vcmask (!%p114_p2), 130048   ;;  %s461_s20 = smov (!%p114_p2), 32   ;;  %vm319_vm1 = vcmask (!%p114_p2), 261120  }
   0x6   : > { %117 = sbr.rel (%p114_p2) target bundleno = 360 (0x168), region = 28  ;;  %v438_v2 = vpack.c.bf16 (!%p114_p2), %v156_v1, %v155_v0  ;;  %p136_p3 = scmp.lt.s32.totalorder (!%p114_p2), %s398_s15, 15  ;;  %vm328_vm2 = vcmask (!%p114_p2), 523264  }
   0x8   : > { %439 = vmatprep.subr.bf16.mxu0 (!%p114_p2), %v438_v2  ;;  %442 = vmatprep.subr.bf16.mxu1 (!%p114_p2), %v438_v2 }
   0x9   : > { %441 = vmatpush3.bf16.msra.mxu0 (!%p114_p2), %v438_v2  ;;  %443 = vmatpush3.bf16.msra.mxu1 (!%p114_p2), %v438_v2 }
   0xd   : > { %s535_s15 = smov (!%p136_p3, %s398_s15), 15 }
   0xe   : > { %s399_s16 = sshll.u32 %s535_s15, 3 }
   0xf   : > { %s139_s19 = scalar_lea.vmem %s532_s1, %s399_s16  ;;  %s145_s23 = scalar_lea.vmem %s533_s2, %s399_s16 }
  0x10   : > { %v147_v3 = vld [vmem:[%s139_s19] sm:$0xff]  ;;  %v148_v5 = vld [vmem:[%s139_s19 + $0x8] sm:$0xff]  ;;  %v149_v7 = vld [vmem:[%s139_s19 + $0x10] sm:$0xff] }
  0x11   : > { %v151_v4 = vld [vmem:[%s139_s19 + $0x20] sm:$0xff]  ;;  %426 = vmatprep.mubr.msk.f32.mxu0 %vm157_vm0, %v147_v3  ;;  %v152_v6 = vld [vmem:[%s139_s19 + $0x28] sm:$0xff]  ;;  %v153_v8 = vld [vmem:[%s139_s19 + $0x30] sm:$0xff] }
  0x12   : > { %432 = vmatprep.mubr.msk.f32.mxu1 %vm157_vm0, %v151_v4  ;;  %427 = vmatmul.mubr.msk.f32.vlgmr.msra.gmra.mrb[0].mxu0 %vm157_vm0, %v148_v5  ;;  %v150_v9 = vld [vmem:[%s139_s19 + $0x18] sm:$0xff] }
  0x13   : > { %433 = vmatmul.mubr.msk.f32.vlgmr.msra.gmra.mrb[0].mxu1 %vm157_vm0, %v152_v6  ;;  %429 = vmatprep.mubr.msk.f32.mxu0 %vm157_vm0, %v149_v7  ;;  %v154_v10 = vld [vmem:[%s139_s19 + $0x38] sm:$0xff] }
  0x14   : > { %435 = vmatprep.mubr.msk.f32.mxu1 %vm157_vm0, %v153_v8 }
  0x16   : > { %430 = vmatmul.mubr.msk.f32.gmra.mrb[2].mxu0 %vm157_vm0, %v150_v9 }
  0x17   : > { %436 = vmatmul.mubr.msk.f32.gmra.mrb[2].mxu1 %vm157_vm0, %v154_v10 }
  0xe5   : > { %v428_v11 = vpop.f32.mrb[0].mxu0 }
  0xe6   : > { %v434_v12 = vpop.f32.mrb[0].mxu1  ;;  %297 = vrot.lane.b32.xlu0 %v428_v11, %s461_s20  ;;  %v248_v14 = vpop.f32.mrb[1].mxu0 }
  0xe7   : > { %305 = vrot.lane.b32.xlu1 %v434_v12, %s461_s20  ;;  %v268_v13 = vpop.f32.mrb[1].mxu1 }
  0xe9   : > { %v431_v15 = vpop.f32.mrb[2].mxu0 }
  0xea   : > { %v437_v16 = vpop.f32.mrb[2].mxu1  ;;  %295 = vrot.lane.b32.xlu0 %v248_v14, %s461_s20  ;;  %v258_v17 = vpop.f32.mrb[3].mxu0 }
  0xeb   : > { %301 = vrot.lane.b32.xlu1 %v431_v15, %s461_s20  ;;  %v278_v18 = vpop.f32.mrb[3].mxu1 }
  0xee   : > { %303 = vrot.lane.b32.xlu0 %v268_v13, %s461_s20 }
  0xef   : > { %299 = vrot.lane.b32.xlu1 %v258_v17, %s461_s20 }
  0xf2   : > { %307 = vrot.lane.b32.xlu0 %v278_v18, %s461_s20 }
  0xf3   : > { %309 = vrot.lane.b32.xlu1 %v437_v16, %s461_s20 }
 0x158   : > { %v298_v20 = vpop.permute.xlu0 %297 }
 0x159   : > { %v306_v19 = vpop.permute.xlu1 %305  ;;  %v321_v22 = vsel %vm319_vm1, %v428_v11, %v298_v20 }
 0x15a   : > { %v325_v21 = vsel %vm319_vm1, %v434_v12, %v306_v19  ;;  %330 = vst.msk [vmem:[%s145_s23 + $0x8] sm:$0xff] %vm328_vm2, %v321_v22 }
 0x15b   : > { %334 = vst.msk [vmem:[%s145_s23 + $0x28] sm:$0xff] %vm328_vm2, %v325_v21 }
 0x15c   : > { %v296_v23 = vpop.permute.xlu0 %295 }
 0x15d   : > { %v302_v24 = vpop.permute.xlu1 %301  ;;  %v320_v25 = vsel %vm319_vm1, %v248_v14, %v296_v23 }
 0x15e   : > { %v323_v26 = vsel %vm319_vm1, %v431_v15, %v302_v24  ;;  %329 = vst.msk [vmem:[%s145_s23] sm:$0xff] %vm328_vm2, %v320_v25 }
 0x15f   : > { %332 = vst.msk [vmem:[%s145_s23 + $0x18] sm:$0xff] %vm328_vm2, %v323_v26 }
 0x160   : > { %v304_v27 = vpop.permute.xlu0 %303 }
 0x161   : > { %v300_v28 = vpop.permute.xlu1 %299  ;;  %v324_v29 = vsel %vm319_vm1, %v268_v13, %v304_v27 }
 0x162   : > { %v322_v30 = vsel %vm319_vm1, %v258_v17, %v300_v28  ;;  %333 = vst.msk [vmem:[%s145_s23 + $0x20] sm:$0xff] %vm328_vm2, %v324_v29 }
 0x163   : > { %331 = vst.msk [vmem:[%s145_s23 + $0x10] sm:$0xff] %vm328_vm2, %v322_v30 }
 0x164   : > { %v308_v31 = vpop.permute.xlu0 %307 }
 0x165   : > { %v310_v32 = vpop.permute.xlu1 %309  ;;  %v326_v33 = vsel %vm319_vm1, %v278_v18, %v308_v31 }
 0x166   : > { %v327_v34 = vsel %vm319_vm1, %v437_v16, %v310_v32  ;;  %335 = vst.msk [vmem:[%s145_s23 + $0x30] sm:$0xff] %vm328_vm2, %v326_v33 }
 0x167   : > { %336 = vst.msk [vmem:[%s145_s23 + $0x38] sm:$0xff] %vm328_vm2, %v327_v34 }
 0x168 PF: > { %s12_s9 = sadd.s32 1, %s459_s9  }
 0x169   : > { %p9_p4 = scmp.ge.s32.totalorder %s12_s9, 4  }
 0x16b   :  { %11 = sbr.rel (!%p9_p4) target bundleno = 1 (0x1), region = 58 }

</bundles_post_ra>
